<compile_context>
chip_gen: v5e
topology: v5e:2x2
jax: 0.10.0
libtpu: 0.0.40
codegen_flags: <defaults>
</compile_context>

<pallas_src>
import jax
import jax.numpy as jnp
from jax.experimental import pallas as pl
from jax.experimental.pallas import tpu as pltpu


# ----------------------------------------------------------------------------- kernel
def _critic_mlp_kernel(x_ref, w1_ref, b1_ref, w2_ref, b2_ref, w3_ref, b3_ref, o_ref):
    """One batch tile of the critic MLP.

    With row packing, x_ref is [tile_rows, pack*d] and the weights are block-diagonal,
    so this single body serves both the packed and the (pack=1) fallback layout.
    """
    h = jnp.dot(x_ref[...], w1_ref[...], preferred_element_type=jnp.float32) + b1_ref[...]
    h = jnp.maximum(h, 0.0)
    h = jnp.dot(h, w2_ref[...], preferred_element_type=jnp.float32) + b2_ref[...]
    h = jnp.maximum(h, 0.0)
    # 1/(1-discount) and average_reward_offset already folded into w3/b3.
    o_ref[...] = jnp.dot(h, w3_ref[...], preferred_element_type=jnp.float32) + b3_ref[...]


# ----------------------------------------------------------------------------- helpers
def _round_up(x, m):
    return -(-x // m) * m


def _tensorcores_per_chip():
    """2 on v7x (dual TensorCore), 1 on v5e/v6e.  Conservative fallback = 1."""
    try:
        kind = jax.devices()[0].device_kind.lower()
        return 2 if ("v7" in kind or "tpu7" in kind) else 1
    except Exception:  # pragma: no cover
        return 1


def _pick_tile_rows(n_rows, max_tile_rows, num_tc):
    """Batch tile in (packed) rows.

    Single grid step on 1-TC chips (per-step overhead is pure loss there).  On v7x,
    split into 2 steps only when each core gets a non-trivial amount of work.
    """
    if num_tc >= 2 and n_rows > 256:
        target = -(-n_rows // 2)          # ceil(n/2): one tile per TensorCore
    else:
        target = n_rows
    return max(8, min(_round_up(max_tile_rows, 8), _round_up(target, 8)))


def _prep_params(params, s_dim, a_dim, discount):
    """One-time parameter prep (tiny tensors): scale fold + row-packing block-diag."""
    w1, b1, w2, b2, w3, b3 = [jnp.asarray(p, jnp.float32) for p in params]
    b1, b2, b3 = b1.reshape(1, -1), b2.reshape(1, -1), b3.reshape(1, -1)
    d = s_dim + a_dim
    # Weights are stored [in_features, out_features] with state features first in the
    # concat (PyTorch nn.Linear weights would need a transpose before calling this).
    assert w1.shape[0] == d, (
        f"w1 must be [state_dim+action_dim, H1]; got {w1.shape} for d={d}")
    assert w2.shape[0] == w1.shape[1] and w3.shape[0] == w2.shape[1]

    # Fold the 1/(1-discount) output scale into the (linear) head -- exact in f32.
    scale = jnp.float32(1.0 / (1.0 - discount))
    w3 = w3 * scale
    b3 = b3 * scale

    # Row-packing factor: pack rows so pack*d == 128 (lane-dense).  Skip packing if the
    # feature width doesn't divide 128 or the block-diagonal weights would get large.
    pack = 128 // d if (128 % d == 0) else 1
    bd_bytes = 4 * pack * pack * (w1.size + w2.size + w3.size)
    if pack > 1 and bd_bytes <= (8 << 20):
        eye = jnp.eye(pack, dtype=jnp.float32)
        w1 = jnp.kron(eye, w1)            # [pack*d,  pack*H1] block diagonal
        w2 = jnp.kron(eye, w2)            # [pack*H1, pack*H2]
        w3 = jnp.kron(eye, w3)            # [pack*H2, pack*out]
        b1 = jnp.tile(b1, (1, pack))
        b2 = jnp.tile(b2, (1, pack))
        b3 = jnp.tile(b3, (1, pack))
    else:
        pack = 1
    return pack, (w1, b1, w2, b2, w3, b3)


# ----------------------------------------------------------------------------- forward
def qfitter_lme_forward(states, actions, params, *, discount=0.99, max_tile_rows=4096):
    """Pallas implementation of QFitterLME.forward.

    states : [N, state_dim]  f32
    actions: [N, action_dim] f32
    params : (w1,b1,w2,b2,w3,b3), w* stored [in_features, out_features]
    returns: [N, 2] f32  == critic_target(states, actions) / (1 - discount)

    The whole dataset goes through ONE pallas_call (batch tiling inside), amortizing the
    module's Python batch_size=1000 chunk loop.
    """
    states = jnp.asarray(states, jnp.float32)
    actions = jnp.asarray(actions, jnp.float32)
    n, s_dim = states.shape
    a_dim = actions.shape[1]
    out_dim = params[4].shape[1]
    d = s_dim + a_dim

    pack, (w1, b1, w2, b2, w3, b3) = _prep_params(params, s_dim, a_dim, discount)

    # --- batch tiling in packed rows ------------------------------------------------
    num_tc = _tensorcores_per_chip()
    n_rows = -(-n // pack)                              # packed rows needed
    tile_rows = _pick_tile_rows(n_rows, max_tile_rows, num_tc)
    num_tiles = -(-n_rows // tile_rows)
    rows_pad = num_tiles * tile_rows
    n_pad = rows_pad * pack

    # --- single wrapper materialization: concat + zero row-pad ----------------------
    x = jnp.concatenate([states, actions], axis=-1)      # [n, d]
    if n_pad != n:
        x = jnp.pad(x, ((0, n_pad - n), (0, 0)))         # padded rows sliced off below
    # Lane-dense packed view: free row-major reshape, pack rows per 128-lane row.
    xp = x.reshape(rows_pad, pack * d)

    k_in = pack * d
    h1 = w1.shape[1]
    h2 = w2.shape[1]
    k_out = w3.shape[1]                                   # pack * out_dim

    full = lambda i: (0, 0)                               # weights/biases stay resident
    flops = 2 * rows_pad * (k_in * h1 + h1 * h2 + h2 * k_out)
    bytes_accessed = 4 * (xp.size + w1.size + b1.size + w2.size + b2.size
                          + w3.size + b3.size + rows_pad * k_out)

    # TODO(synk): on v7x, verify the batch axis is actually core-sharded (or switch to
    # pltpu.CORE_PARALLEL); on v5e/v6e "parallel" vs "arbitrary" is a measured no-op.
    out = pl.pallas_call(
        _critic_mlp_kernel,
        out_shape=jax.ShapeDtypeStruct((rows_pad, k_out), jnp.float32),
        grid_spec=pltpu.PrefetchScalarGridSpec(
            num_scalar_prefetch=0,
            grid=(num_tiles,),
            in_specs=[
                pl.BlockSpec((tile_rows, k_in), lambda i: (i, 0)),   # packed x tile
                pl.BlockSpec((k_in, h1), full),                      # W1 (block-diag)
                pl.BlockSpec((1, h1), full),                         # b1 (tiled)
                pl.BlockSpec((h1, h2), full),                        # W2 (block-diag)
                pl.BlockSpec((1, h2), full),                         # b2 (tiled)
                pl.BlockSpec((h2, k_out), full),                     # W3 * 1/(1-disc)
                pl.BlockSpec((1, k_out), full),                      # b3 * 1/(1-disc)
            ],
            out_specs=pl.BlockSpec((tile_rows, k_out), lambda i: (i, 0)),
        ),
        compiler_params=pltpu.CompilerParams(
            dimension_semantics=("parallel",)),
        cost_estimate=pl.CostEstimate(
            flops=flops, transcendentals=0, bytes_accessed=bytes_accessed),
    )(xp, w1, b1, w2, b2, w3, b3)

    # Unpack rows (free reshape) and drop the zero-padded garbage rows.
    return out.reshape(n_pad, out_dim)[:n]


# ----------------------------------------------------------------------------- reference
def init_critic_params(key, state_dim, action_dim, hidden_sizes, out_dim,
                       average_reward_offset):
    """Deterministic synthetic init of CriticNetL2 parameters ([in, out] layout)."""
    d = state_dim + action_dim
    dims = [d] + list(hidden_sizes) + [out_dim]
    keys = jax.random.split(key, 2 * (len(dims) - 1))
    params = []
    for li in range(len(dims) - 1):
        fan_in, fan_out = dims[li], dims[li + 1]
        wk, bk = keys[2 * li], keys[2 * li + 1]
        s = 1.0 / jnp.sqrt(jnp.float32(fan_in))
        w = jax.random.uniform(wk, (fan_in, fan_out), jnp.float32, -s, s)
        b = jax.random.uniform(bk, (1, fan_out), jnp.float32, -s, s)
        params.extend([w, b])
    w1, b1, w2, b2, w3, b3 = params
    # Fold average_reward_offset into the final bias, Q head (column 0).
    offset = jnp.zeros((1, out_dim), jnp.float32).at[0, 0].set(average_reward_offset)
    return (w1, b1, w2, b2, w3, b3 + offset)


def reference_forward(states, actions, params, discount):
    """Pure-JAX reference of the same forward pass (raw params, explicit scale)."""
    w1, b1, w2, b2, w3, b3 = params
    x = jnp.concatenate([states, actions], axis=-1)
    h = jnp.maximum(x @ w1 + b1, 0.0)
    h = jnp.maximum(h @ w2 + b2, 0.0)
    return (h @ w3 + b3) / (1.0 - discount)


if __name__ == "__main__":
    key = jax.random.PRNGKey(0)
    k_params, k_states, k_actions = jax.random.split(key, 3)

    # Small shapes consistent with the module's interface.
    state_dim, action_dim = 12, 4
    hidden_sizes = (32, 32)
    out_dim = 2                       # CriticNetL2(output_size=2)
    n = 16                            # batch (pad + pack paths are exercised: pads to 64)
    discount = 0.99
    average_reward = 0.5
    avg_reward_offset = average_reward * (1.0 - discount)

    params = init_critic_params(k_params, state_dim, action_dim, hidden_sizes,
                                out_dim, avg_reward_offset)
    states = jax.random.normal(k_states, (n, state_dim), jnp.float32)
    actions = jax.random.normal(k_actions, (n, action_dim), jnp.float32)

    out = qfitter_lme_forward(states, actions, params, discount=discount)
    out = jax.block_until_ready(out)

    ref = reference_forward(states, actions, params, discount)
    assert out.shape == (n, out_dim), out.shape
    assert jnp.allclose(out, ref, atol=1e-3, rtol=1e-4), "mismatch vs reference"

    print("KERNEL_OK")
</pallas_src>

<mosaic_0001>
module attributes {stable_mosaic.version = 11 : i64} {
  func.func @_critic_mlp_kernel(%arg0: i32, %arg1: memref<8x128xf32, #tpu.memory_space<vmem>>, %arg2: memref<128x256xf32, #tpu.memory_space<vmem>>, %arg3: memref<1x256xf32, #tpu.memory_space<vmem>>, %arg4: memref<256x256xf32, #tpu.memory_space<vmem>>, %arg5: memref<1x256xf32, #tpu.memory_space<vmem>>, %arg6: memref<256x16xf32, #tpu.memory_space<vmem>>, %arg7: memref<1x16xf32, #tpu.memory_space<vmem>>, %arg8: memref<8x16xf32, #tpu.memory_space<vmem>>) attributes {dimension_semantics = [#tpu.dimension_semantics<parallel>], iteration_bounds = array<i64: 1>, scalar_prefetch = 0 : i64, scratch_operands = 0 : i64, tpu.core_type = #tpu.core_type<tc>, window_params = [{transform_indices = @transform_0, window_bounds = array<i64: 8, 128>}, {pipeline_mode = #tpu.pipeline_mode<synchronous>, transform_indices = @transform_1, window_bounds = array<i64: 128, 256>}, {pipeline_mode = #tpu.pipeline_mode<synchronous>, transform_indices = @transform_2, window_bounds = array<i64: 1, 256>}, {pipeline_mode = #tpu.pipeline_mode<synchronous>, transform_indices = @transform_3, window_bounds = array<i64: 256, 256>}, {pipeline_mode = #tpu.pipeline_mode<synchronous>, transform_indices = @transform_4, window_bounds = array<i64: 1, 256>}, {pipeline_mode = #tpu.pipeline_mode<synchronous>, transform_indices = @transform_5, window_bounds = array<i64: 256, 16>}, {pipeline_mode = #tpu.pipeline_mode<synchronous>, transform_indices = @transform_6, window_bounds = array<i64: 1, 16>}, {transform_indices = @transform_7, window_bounds = array<i64: 8, 16>}]} {
    %c0 = arith.constant 0 : index
    %c0_0 = arith.constant 0 : index
    %0 = vector.load %arg1[%c0, %c0_0] : memref<8x128xf32, #tpu.memory_space<vmem>>, vector<8x128xf32>
    %c0_1 = arith.constant 0 : index
    %c0_2 = arith.constant 0 : index
    %1 = vector.load %arg2[%c0_1, %c0_2] : memref<128x256xf32, #tpu.memory_space<vmem>>, vector<128x256xf32>
    %cst = arith.constant dense<0.000000e+00> : vector<8x256xf32>
    %2 = tpu.matmul %0, %1, %cst {dimension_numbers = #tpu.dot_dimension_numbers<[1], [0], [0], [1], [0, 0, 1, 1], [], []>} : vector<8x128xf32>, vector<128x256xf32>, vector<8x256xf32> -> vector<8x256xf32>
    %c0_3 = arith.constant 0 : index
    %c0_4 = arith.constant 0 : index
    %3 = vector.load %arg3[%c0_3, %c0_4] : memref<1x256xf32, #tpu.memory_space<vmem>>, vector<1x256xf32>
    %4 = vector.broadcast %3 : vector<1x256xf32> to vector<8x256xf32>
    %5 = arith.addf %2, %4 : vector<8x256xf32>
    %cst_5 = arith.constant 0.000000e+00 : f32
    %6 = vector.broadcast %cst_5 : f32 to vector<8x256xf32>
    %7 = arith.maximumf %5, %6 : vector<8x256xf32>
    %c0_6 = arith.constant 0 : index
    %c0_7 = arith.constant 0 : index
    %8 = vector.load %arg4[%c0_6, %c0_7] : memref<256x256xf32, #tpu.memory_space<vmem>>, vector<256x256xf32>
    %cst_8 = arith.constant dense<0.000000e+00> : vector<8x256xf32>
    %9 = tpu.matmul %7, %8, %cst_8 {dimension_numbers = #tpu.dot_dimension_numbers<[1], [0], [0], [1], [0, 0, 1, 1], [], []>} : vector<8x256xf32>, vector<256x256xf32>, vector<8x256xf32> -> vector<8x256xf32>
    %c0_9 = arith.constant 0 : index
    %c0_10 = arith.constant 0 : index
    %10 = vector.load %arg5[%c0_9, %c0_10] : memref<1x256xf32, #tpu.memory_space<vmem>>, vector<1x256xf32>
    %11 = vector.broadcast %10 : vector<1x256xf32> to vector<8x256xf32>
    %12 = arith.addf %9, %11 : vector<8x256xf32>
    %cst_11 = arith.constant 0.000000e+00 : f32
    %13 = vector.broadcast %cst_11 : f32 to vector<8x256xf32>
    %14 = arith.maximumf %12, %13 : vector<8x256xf32>
    %c0_12 = arith.constant 0 : index
    %c0_13 = arith.constant 0 : index
    %15 = vector.load %arg6[%c0_12, %c0_13] : memref<256x16xf32, #tpu.memory_space<vmem>>, vector<256x16xf32>
    %cst_14 = arith.constant dense<0.000000e+00> : vector<8x16xf32>
    %16 = tpu.matmul %14, %15, %cst_14 {dimension_numbers = #tpu.dot_dimension_numbers<[1], [0], [0], [1], [0, 0, 1, 1], [], []>} : vector<8x256xf32>, vector<256x16xf32>, vector<8x16xf32> -> vector<8x16xf32>
    %c0_15 = arith.constant 0 : index
    %c0_16 = arith.constant 0 : index
    %17 = vector.load %arg7[%c0_15, %c0_16] : memref<1x16xf32, #tpu.memory_space<vmem>>, vector<1x16xf32>
    %18 = vector.broadcast %17 : vector<1x16xf32> to vector<8x16xf32>
    %19 = arith.addf %16, %18 : vector<8x16xf32>
    %c0_17 = arith.constant 0 : index
    %c0_18 = arith.constant 0 : index
    %20 = vector.load %arg8[%c0_17, %c0_18] : memref<8x16xf32, #tpu.memory_space<vmem>>, vector<8x16xf32>
    tpu.vector_store %arg8[%c0_17, %c0_18], %19 {strides = array<i32>} : memref<8x16xf32, #tpu.memory_space<vmem>>, vector<8x16xf32>,
    return
  }
  func.func @transform_0(%arg0: i32) -> (i32, i32) {
    %c0_i32 = arith.constant 0 : i32
    %c0_i32_0 = arith.constant 0 : i32
    return %arg0, %c0_i32 : i32, i32
  }
  func.func @transform_1(%arg0: i32) -> (i32, i32) {
    %c0_i32 = arith.constant 0 : i32
    %c0_i32_0 = arith.constant 0 : i32
    %c0_i32_1 = arith.constant 0 : i32
    return %c0_i32, %c0_i32_0 : i32, i32
  }
  func.func @transform_2(%arg0: i32) -> (i32, i32) {
    %c0_i32 = arith.constant 0 : i32
    %c0_i32_0 = arith.constant 0 : i32
    %c0_i32_1 = arith.constant 0 : i32
    return %c0_i32, %c0_i32_0 : i32, i32
  }
  func.func @transform_3(%arg0: i32) -> (i32, i32) {
    %c0_i32 = arith.constant 0 : i32
    %c0_i32_0 = arith.constant 0 : i32
    %c0_i32_1 = arith.constant 0 : i32
    return %c0_i32, %c0_i32_0 : i32, i32
  }
  func.func @transform_4(%arg0: i32) -> (i32, i32) {
    %c0_i32 = arith.constant 0 : i32
    %c0_i32_0 = arith.constant 0 : i32
    %c0_i32_1 = arith.constant 0 : i32
    return %c0_i32, %c0_i32_0 : i32, i32
  }
  func.func @transform_5(%arg0: i32) -> (i32, i32) {
    %c0_i32 = arith.constant 0 : i32
    %c0_i32_0 = arith.constant 0 : i32
    %c0_i32_1 = arith.constant 0 : i32
    return %c0_i32, %c0_i32_0 : i32, i32
  }
  func.func @transform_6(%arg0: i32) -> (i32, i32) {
    %c0_i32 = arith.constant 0 : i32
    %c0_i32_0 = arith.constant 0 : i32
    %c0_i32_1 = arith.constant 0 : i32
    return %c0_i32, %c0_i32_0 : i32, i32
  }
  func.func @transform_7(%arg0: i32) -> (i32, i32) {
    %c0_i32 = arith.constant 0 : i32
    %c0_i32_0 = arith.constant 0 : i32
    return %arg0, %c0_i32 : i32, i32
  }
}

</mosaic_0001>

<bundles_post_ra>
// kernel: tpu_custom_call.1
= control target key start
LH: loop header
LB: loop body
LE: loop exit
PB: predicated region body
PF: predicated region fallthrough
CT: control target
= control target key end

     0   :  { %12 = vsyncpa [#allocation3], 0  ;;  %s682_s0 = inlined_call_operand.vmem [shape: f32[8,128], index: 0, kind: input, shape index: {}]   ;;  %s683_s1 = inlined_call_operand.vmem [shape: f32[128,256], index: 1, kind: input, shape index: {}]   ;;  %s684_s2 = inlined_call_operand.vmem [shape: f32[1,256], index: 2, kind: input, shape index: {}]   ;;  %s685_s3 = inlined_call_operand.hbm [shape: f32[256,256], index: 3, kind: input, shape index: {}]   ;;  %s686_s4 = inlined_call_operand.vmem [shape: f32[1,256], index: 4, kind: input, shape index: {}]   ;;  %s687_s5 = inlined_call_operand.vmem [shape: f32[256,16], index: 5, kind: input, shape index: {}]   ;;  %s688_s6 = inlined_call_operand.vmem [shape: f32[1,16], index: 6, kind: input, shape index: {}]   ;;  %s689_s7 = inlined_call_operand.hbm [shape: f32[8,16], index: 7, kind: output, shape index: {}]  }
   0x1   :  { %13 = vsyncpa [#allocation4], 0  ;;  %s24_s26 = sshll.u32 %s685_s3, 4  ;;  %s428_s27 = smov [#allocation2]   ;;  %s25_s26 = int_to_ptr.hbm [resolvable:$true] %s24_s26 }
   0x2   :  { %s26_s28 = sshll.u32 %s428_s27, 4  ;;  %s429_s29 = smov 256   ;;  %s27_s28 = int_to_ptr.vmem [resolvable:$true] %s26_s28 }
   0x3   :  { %s430_s30 = smov 16  }
   0x4   :  { %32 = dma.hbm_to_vmem [thread:$0]  %s25_s26, 8192, %s27_s28, [#allocation3], %s429_s29, %s429_s29, %s430_s30  }
   0x5   :  { %424 = dma.done.wait [#allocation3], 8192  }
   0x6   :  { %425 = vsyncadd [#allocation3], 4294959104  ;;  %v74_v0 = vld [vmem:[%s683_s1 + $0xf0] sm:$0xff]  ;;  %v72_v1 = vld [vmem:[%s683_s1 + $0xe0] sm:$0xff]  ;;  %vm352_vm0 = vcmask 130048  }
   0x7   :  { %v75_v2 = vld [vmem:[%s683_s1 + $0xf8] sm:$0xff]  ;;  %82 = vmatpush.msra.mxu0 %v74_v0  ;;  %v73_v3 = vld [vmem:[%s683_s1 + $0xe8] sm:$0xff]  ;;  %v70_v4 = vld [vmem:[%s683_s1 + $0xd0] sm:$0xff] }
   0x8   :  { %102 = vmatpush.msra.mxu1 %v75_v2  ;;  %v71_v5 = vld [vmem:[%s683_s1 + $0xd8] sm:$0xff]  ;;  %v68_v6 = vld [vmem:[%s683_s1 + $0xc0] sm:$0xff]  ;;  %v69_v7 = vld [vmem:[%s683_s1 + $0xc8] sm:$0xff] }
   0x9   :  { %83 = vmatpush.msra.mxu0 %v72_v1  ;;  %v66_v8 = vld [vmem:[%s683_s1 + $0xb0] sm:$0xff]  ;;  %v67_v9 = vld [vmem:[%s683_s1 + $0xb8] sm:$0xff]  ;;  %v64_v10 = vld [vmem:[%s683_s1 + $0xa0] sm:$0xff] }
   0xa   :  { %103 = vmatpush.msra.mxu1 %v73_v3  ;;  %v65_v11 = vld [vmem:[%s683_s1 + $0xa8] sm:$0xff]  ;;  %v62_v12 = vld [vmem:[%s683_s1 + $0x90] sm:$0xff]  ;;  %v63_v13 = vld [vmem:[%s683_s1 + $0x98] sm:$0xff] }
   0xb   :  { %84 = vmatpush.msra.mxu0 %v70_v4  ;;  %v154_v14 = vld [vmem:[#allocation2 + $0xf0] sm:$0xff]  ;;  %v152_v15 = vld [vmem:[#allocation2 + $0xe0] sm:$0xff]  ;;  %v61_v17 = vld [vmem:[%s683_s1 + $0x88] sm:$0xff] }
   0xc   :  { %104 = vmatpush.msra.mxu1 %v71_v5  ;;  %v60_v16 = vld [vmem:[%s683_s1 + $0x80] sm:$0xff]  ;;  %194 = vmatpush.msra.mxu2 %v154_v14  ;;  %v186_v18 = vld [vmem:[#allocation2 + $0x1f0] sm:$0xff]  ;;  %v59_v22 = vld [vmem:[%s683_s1 + $0x78] sm:$0xff] }
   0xd   :  { %85 = vmatpush.msra.mxu0 %v68_v6  ;;  %v150_v19 = vld [vmem:[#allocation2 + $0xd0] sm:$0xff]  ;;  %v184_v20 = vld [vmem:[#allocation2 + $0x1e0] sm:$0xff]  ;;  %214 = vmatpush.msra.mxu3 %v186_v18  ;;  %v57_v26 = vld [vmem:[%s683_s1 + $0x68] sm:$0xff] }
   0xe   :  { %105 = vmatpush.msra.mxu1 %v69_v7  ;;  %v58_v21 = vld [vmem:[%s683_s1 + $0x70] sm:$0xff]  ;;  %195 = vmatpush.msra.mxu2 %v152_v15  ;;  %v148_v23 = vld [vmem:[#allocation2 + $0xc0] sm:$0xff]  ;;  %v55_v30 = vld [vmem:[%s683_s1 + $0x58] sm:$0xff] }
   0xf   :  { %86 = vmatpush.msra.mxu0 %v66_v8  ;;  %v182_v24 = vld [vmem:[#allocation2 + $0x1d0] sm:$0xff]  ;;  %v56_v25 = vld [vmem:[%s683_s1 + $0x60] sm:$0xff]  ;;  %215 = vmatpush.msra.mxu3 %v184_v20  ;;  %v53_v34 = vld [vmem:[%s683_s1 + $0x48] sm:$0xff] }
  0x10   :  { %106 = vmatpush.msra.mxu1 %v67_v9  ;;  %196 = vmatpush.msra.mxu2 %v150_v19  ;;  %v146_v27 = vld [vmem:[#allocation2 + $0xb0] sm:$0xff]  ;;  %v180_v28 = vld [vmem:[#allocation2 + $0x1c0] sm:$0xff]  ;;  %v51_v38 = vld [vmem:[%s683_s1 + $0x38] sm:$0xff] }
  0x11   :  { %87 = vmatpush.msra.mxu0 %v64_v10  ;;  %v54_v29 = vld [vmem:[%s683_s1 + $0x50] sm:$0xff]  ;;  %216 = vmatpush.msra.mxu3 %v182_v24  ;;  %v144_v31 = vld [vmem:[#allocation2 + $0xa0] sm:$0xff]  ;;  %v49_v42 = vld [vmem:[%s683_s1 + $0x28] sm:$0xff] }
  0x12   :  { %107 = vmatpush.msra.mxu1 %v65_v11  ;;  %197 = vmatpush.msra.mxu2 %v148_v23  ;;  %v178_v32 = vld [vmem:[#allocation2 + $0x1b0] sm:$0xff]  ;;  %v52_v33 = vld [vmem:[%s683_s1 + $0x40] sm:$0xff]  ;;  %v47_v46 = vld [vmem:[%s683_s1 + $0x18] sm:$0xff] }
  0x13   :  { %88 = vmatpush.msra.mxu0 %v62_v12  ;;  %217 = vmatpush.msra.mxu3 %v180_v28  ;;  %v142_v35 = vld [vmem:[#allocation2 + $0x90] sm:$0xff]  ;;  %v176_v36 = vld [vmem:[#allocation2 + $0x1a0] sm:$0xff]  ;;  %v45_v50 = vld [vmem:[%s683_s1 + $0x8] sm:$0xff] }
  0x14   :  { %108 = vmatpush.msra.mxu1 %v63_v13  ;;  %198 = vmatpush.msra.mxu2 %v146_v27  ;;  %v50_v37 = vld [vmem:[%s683_s1 + $0x30] sm:$0xff]  ;;  %v140_v39 = vld [vmem:[#allocation2 + $0x80] sm:$0xff]  ;;  %v155_v52 = vld [vmem:[#allocation2 + $0xf8] sm:$0xff] }
  0x15   :  { %89 = vmatpush.msra.mxu0 %v60_v16  ;;  %218 = vmatpush.msra.mxu3 %v178_v32  ;;  %v174_v40 = vld [vmem:[#allocation2 + $0x190] sm:$0xff]  ;;  %v48_v41 = vld [vmem:[%s683_s1 + $0x20] sm:$0xff]  ;;  %v187_v53 = vld [vmem:[#allocation2 + $0x1f8] sm:$0xff] }
  0x16   :  { %109 = vmatpush.msra.mxu1 %v61_v17  ;;  %199 = vmatpush.msra.mxu2 %v144_v31  ;;  %v138_v43 = vld [vmem:[#allocation2 + $0x70] sm:$0xff]  ;;  %v172_v44 = vld [vmem:[#allocation2 + $0x180] sm:$0xff]  ;;  %v153_v56 = vld [vmem:[#allocation2 + $0xe8] sm:$0xff] }
  0x17   :  { %90 = vmatpush.msra.mxu0 %v58_v21  ;;  %219 = vmatpush.msra.mxu3 %v176_v36  ;;  %v46_v45 = vld [vmem:[%s683_s1 + $0x10] sm:$0xff]  ;;  %v136_v47 = vld [vmem:[#allocation2 + $0x60] sm:$0xff]  ;;  %v185_v57 = vld [vmem:[#allocation2 + $0x1e8] sm:$0xff] }
  0x18   :  { %110 = vmatpush.msra.mxu1 %v59_v22  ;;  %200 = vmatpush.msra.mxu2 %v142_v35  ;;  %v170_v48 = vld [vmem:[#allocation2 + $0x170] sm:$0xff]  ;;  %v44_v49 = vld [vmem:[%s683_s1] sm:$0xff]  ;;  %v151_v60 = vld [vmem:[#allocation2 + $0xd8] sm:$0xff] }
  0x19   :  { %91 = vmatpush.msra.mxu0 %v56_v25  ;;  %220 = vmatpush.msra.mxu3 %v174_v40  ;;  %v43_v51 = vld [vmem:[%s682_s0] sm:$0xff]  ;;  %v134_v54 = vld [vmem:[#allocation2 + $0x50] sm:$0xff]  ;;  %v183_v61 = vld [vmem:[#allocation2 + $0x1d8] sm:$0xff] }
  0x1a   :  { %111 = vmatpush.msra.mxu1 %v57_v26  ;;  %201 = vmatpush.msra.mxu2 %v140_v39  ;;  %v168_v55 = vld [vmem:[#allocation2 + $0x160] sm:$0xff]  ;;  %v166_v59 = vld [vmem:[#allocation2 + $0x150] sm:$0xff]  ;;  %v149_v0 = vld [vmem:[#allocation2 + $0xc8] sm:$0xff] }
  0x1b   :  { %92 = vmatpush.msra.mxu0 %v54_v29  ;;  %221 = vmatpush.msra.mxu3 %v172_v44  ;;  %v132_v58 = vld [vmem:[#allocation2 + $0x40] sm:$0xff]  ;;  %v130_v62 = vld [vmem:[#allocation2 + $0x30] sm:$0xff]  ;;  %v181_v1 = vld [vmem:[#allocation2 + $0x1c8] sm:$0xff] }
  0x1c   :  { %112 = vmatpush.msra.mxu1 %v55_v30  ;;  %202 = vmatpush.msra.mxu2 %v138_v43  ;;  %v164_v63 = vld [vmem:[#allocation2 + $0x140] sm:$0xff]  ;;  %v147_v2 = vld [vmem:[#allocation2 + $0xb8] sm:$0xff]  ;;  %v145_v4 = vld [vmem:[#allocation2 + $0xa8] sm:$0xff] }
  0x1d   :  { %93 = vmatpush.msra.mxu0 %v52_v33  ;;  %222 = vmatpush.msra.mxu3 %v170_v48  ;;  %v179_v3 = vld [vmem:[#allocation2 + $0x1b8] sm:$0xff]  ;;  %v177_v5 = vld [vmem:[#allocation2 + $0x1a8] sm:$0xff]  ;;  %v128_v19 = vld [vmem:[#allocation2 + $0x20] sm:$0xff] }
  0x1e   :  { %113 = vmatpush.msra.mxu1 %v53_v34  ;;  %203 = vmatpush.msra.mxu2 %v136_v47  ;;  %v143_v6 = vld [vmem:[#allocation2 + $0x98] sm:$0xff]  ;;  %v141_v8 = vld [vmem:[#allocation2 + $0x88] sm:$0xff]  ;;  %v162_v20 = vld [vmem:[#allocation2 + $0x130] sm:$0xff] }
  0x1f   :  { %94 = vmatpush.msra.mxu0 %v50_v37  ;;  %223 = vmatpush.msra.mxu3 %v168_v55  ;;  %v175_v7 = vld [vmem:[#allocation2 + $0x198] sm:$0xff]  ;;  %v173_v9 = vld [vmem:[#allocation2 + $0x188] sm:$0xff]  ;;  %v126_v23 = vld [vmem:[#allocation2 + $0x10] sm:$0xff] }
  0x20   :  { %114 = vmatpush.msra.mxu1 %v51_v38  ;;  %204 = vmatpush.msra.mxu2 %v134_v54  ;;  %v139_v10 = vld [vmem:[#allocation2 + $0x78] sm:$0xff]  ;;  %v137_v12 = vld [vmem:[#allocation2 + $0x68] sm:$0xff]  ;;  %v160_v24 = vld [vmem:[#allocation2 + $0x120] sm:$0xff] }
  0x21   :  { %95 = vmatpush.msra.mxu0 %v48_v41  ;;  %224 = vmatpush.msra.mxu3 %v166_v59  ;;  %v171_v11 = vld [vmem:[#allocation2 + $0x178] sm:$0xff]  ;;  %v169_v13 = vld [vmem:[#allocation2 + $0x168] sm:$0xff]  ;;  %v124_v27 = vld [vmem:[#allocation2] sm:$0xff] }
  0x22   :  { %115 = vmatpush.msra.mxu1 %v49_v42  ;;  %205 = vmatpush.msra.mxu2 %v132_v58  ;;  %v135_v14 = vld [vmem:[#allocation2 + $0x58] sm:$0xff]  ;;  %v133_v16 = vld [vmem:[#allocation2 + $0x48] sm:$0xff]  ;;  %v158_v28 = vld [vmem:[#allocation2 + $0x110] sm:$0xff] }
  0x23   :  { %96 = vmatpush.msra.mxu0 %v46_v45  ;;  %225 = vmatpush.msra.mxu3 %v164_v63  ;;  %v167_v15 = vld [vmem:[#allocation2 + $0x158] sm:$0xff]  ;;  %v165_v17 = vld [vmem:[#allocation2 + $0x148] sm:$0xff]  ;;  %v156_v31 = vld [vmem:[#allocation2 + $0x100] sm:$0xff] }
  0x24   :  { %116 = vmatpush.msra.mxu1 %v47_v46  ;;  %206 = vmatpush.msra.mxu2 %v130_v62  ;;  %v131_v18 = vld [vmem:[#allocation2 + $0x38] sm:$0xff]  ;;  %v129_v21 = vld [vmem:[#allocation2 + $0x28] sm:$0xff]  ;;  %v306_v34 = vld [vmem:[%s687_s5 + $0xf0] sm:$0xff] }
  0x25   :  { %97 = vmatpush.msra.mxu0 %v44_v49  ;;  %226 = vmatpush.msra.mxu3 %v162_v20  ;;  %v163_v22 = vld [vmem:[#allocation2 + $0x138] sm:$0xff]  ;;  %v161_v26 = vld [vmem:[#allocation2 + $0x128] sm:$0xff]  ;;  %v290_v36 = vld [vmem:[%s687_s5 + $0x70] sm:$0xff] }
  0x26   :  { %117 = vmatpush.msra.mxu1 %v45_v50  ;;  %98 = vmatmul.f32.vlgmr.msra.gmra.mxu0 %v43_v51  ;;  %v127_v25 = vld [vmem:[#allocation2 + $0x18] sm:$0xff]  ;;  %v125_v29 = vld [vmem:[#allocation2 + $0x8] sm:$0xff]  ;;  %v304_v39 = vld [vmem:[%s687_s5 + $0xe0] sm:$0xff] }
  0x27   :  { %118 = vmatmul.f32.vlgmr.msra.gmra.mxu1 %v43_v51  ;;  %234 = vmatpush.msrb.mxu0 %v155_v52  ;;  %v159_v30 = vld [vmem:[#allocation2 + $0x118] sm:$0xff]  ;;  %v157_v32 = vld [vmem:[#allocation2 + $0x108] sm:$0xff]  ;;  %v288_v40 = vld [vmem:[%s687_s5 + $0x60] sm:$0xff] }
  0x28   :  { %254 = vmatpush.msrb.mxu1 %v187_v53  ;;  %207 = vmatpush.msra.mxu2 %v128_v19  ;;  %v307_v33 = vld [vmem:[%s687_s5 + $0xf8] sm:$0xff]  ;;  %v305_v37 = vld [vmem:[%s687_s5 + $0xe8] sm:$0xff]  ;;  %v302_v43 = vld [vmem:[%s687_s5 + $0xd0] sm:$0xff] }
  0x29   :  { %235 = vmatpush.msrb.mxu0 %v153_v56  ;;  %227 = vmatpush.msra.mxu3 %v160_v24  ;;  %v291_v35 = vld [vmem:[%s687_s5 + $0x78] sm:$0xff]  ;;  %v289_v38 = vld [vmem:[%s687_s5 + $0x68] sm:$0xff]  ;;  %v286_v44 = vld [vmem:[%s687_s5 + $0x50] sm:$0xff] }
  0x2a   :  { %255 = vmatpush.msrb.mxu1 %v185_v57  ;;  %208 = vmatpush.msra.mxu2 %v126_v23  ;;  %v303_v41 = vld [vmem:[%s687_s5 + $0xd8] sm:$0xff]  ;;  %v301_v45 = vld [vmem:[%s687_s5 + $0xc8] sm:$0xff]  ;;  %v300_v47 = vld [vmem:[%s687_s5 + $0xc0] sm:$0xff] }
  0x2b   :  { %236 = vmatpush.msrb.mxu0 %v151_v60  ;;  %228 = vmatpush.msra.mxu3 %v158_v28  ;;  %v287_v42 = vld [vmem:[%s687_s5 + $0x58] sm:$0xff]  ;;  %v285_v46 = vld [vmem:[%s687_s5 + $0x48] sm:$0xff]  ;;  %v284_v48 = vld [vmem:[%s687_s5 + $0x40] sm:$0xff] }
  0x2c   :  { %256 = vmatpush.msrb.mxu1 %v183_v61  ;;  %209 = vmatpush.msra.mxu2 %v124_v27  ;;  %v299_v49 = vld [vmem:[%s687_s5 + $0xb8] sm:$0xff]  ;;  %v298_v51 = vld [vmem:[%s687_s5 + $0xb0] sm:$0xff]  ;;  %v297_v52 = vld [vmem:[%s687_s5 + $0xa8] sm:$0xff] }
  0x2d   :  { %237 = vmatpush.msrb.mxu0 %v149_v0  ;;  %229 = vmatpush.msra.mxu3 %v156_v31  ;;  %v283_v50 = vld [vmem:[%s687_s5 + $0x38] sm:$0xff]  ;;  %v76_v53 = vld [vmem:[%s684_s2] sm:$0x3]  ;;  %v282_v63 = vld [vmem:[%s687_s5 + $0x30] sm:$0xff]  ;;  %s361_s2 = sshll.u32 %s689_s7, 4  ;;  %s362_s2 = int_to_ptr.hbm [resolvable:$true] %s361_s2 }
  0x2e   :  { %257 = vmatpush.msrb.mxu1 %v181_v1  ;;  %312 = vmatpush.msrb.mxu2 %v291_v35  ;;  %v296_v54 = vld [vmem:[%s687_s5 + $0xa0] sm:$0xff]  ;;  %v78_v55 = vperm.slane %v76_v53, 0  ;;  %v79_v56 = vperm.slane %v76_v53, 1  ;;  %v295_v0 = vld [vmem:[%s687_s5 + $0x98] sm:$0xff]  ;;  %v281_v1 = vld [vmem:[%s687_s5 + $0x28] sm:$0xff] }
  0x2f   :  { %238 = vmatpush.msrb.mxu0 %v147_v2  ;;  %332 = vmatpush.msrb.mxu3 %v307_v33  ;;  %v294_v2 = vld [vmem:[%s687_s5 + $0x90] sm:$0xff]  ;;  %v375_v23 = vld [vmem:[%s688_s6] ss:$0 sm:$0xff] }
  0x30   :  { %258 = vmatpush.msrb.mxu1 %v179_v3  ;;  %313 = vmatpush.msrb.mxu2 %v290_v36  ;;  %v280_v3 = vld [vmem:[%s687_s5 + $0x20] sm:$0xff] }
  0x31   :  { %239 = vmatpush.msrb.mxu0 %v145_v4  ;;  %333 = vmatpush.msrb.mxu3 %v306_v34  ;;  %v293_v4 = vld [vmem:[%s687_s5 + $0x88] sm:$0xff] }
  0x32   :  { %259 = vmatpush.msrb.mxu1 %v177_v5  ;;  %314 = vmatpush.msrb.mxu2 %v289_v38  ;;  %v279_v5 = vld [vmem:[%s687_s5 + $0x18] sm:$0xff] }
  0x33   :  { %240 = vmatpush.msrb.mxu0 %v143_v6  ;;  %334 = vmatpush.msrb.mxu3 %v305_v37  ;;  %v292_v6 = vld [vmem:[%s687_s5 + $0x80] sm:$0xff] }
  0x34   :  { %260 = vmatpush.msrb.mxu1 %v175_v7  ;;  %315 = vmatpush.msrb.mxu2 %v288_v40  ;;  %v278_v7 = vld [vmem:[%s687_s5 + $0x10] sm:$0xff] }
  0x35   :  { %241 = vmatpush.msrb.mxu0 %v141_v8  ;;  %335 = vmatpush.msrb.mxu3 %v304_v39  ;;  %v277_v8 = vld [vmem:[%s687_s5 + $0x8] sm:$0xff] }
  0x36   :  { %261 = vmatpush.msrb.mxu1 %v173_v9  ;;  %316 = vmatpush.msrb.mxu2 %v287_v42  ;;  %v276_v9 = vld [vmem:[%s687_s5] sm:$0xff] }
  0x37   :  { %242 = vmatpush.msrb.mxu0 %v139_v10  ;;  %336 = vmatpush.msrb.mxu3 %v303_v41  ;;  %v188_v10 = vld [vmem:[%s686_s4] sm:$0x3]  ;;  %s431_s4 = smov [#allocation5]  }
  0x38   :  { %262 = vmatpush.msrb.mxu1 %v171_v11  ;;  %317 = vmatpush.msrb.mxu2 %v286_v44  ;;  %v191_v11 = vperm.slane %v188_v10, 1  ;;  %s359_s15 = sshll.u32 %s431_s4, 4  ;;  %s360_s15 = int_to_ptr.vmem [resolvable:$true] %s359_s15 }
  0x39   :  { %243 = vmatpush.msrb.mxu0 %v137_v12  ;;  %337 = vmatpush.msrb.mxu3 %v302_v43 }
  0x3a   :  { %263 = vmatpush.msrb.mxu1 %v169_v13  ;;  %318 = vmatpush.msrb.mxu2 %v285_v46 }
  0x3b   :  { %244 = vmatpush.msrb.mxu0 %v135_v14  ;;  %338 = vmatpush.msrb.mxu3 %v301_v45 }
  0x3c   :  { %264 = vmatpush.msrb.mxu1 %v167_v15  ;;  %319 = vmatpush.msrb.mxu2 %v284_v48 }
  0x3d   :  { %245 = vmatpush.msrb.mxu0 %v133_v16  ;;  %339 = vmatpush.msrb.mxu3 %v300_v47  ;;  %v190_v16 = vperm.slane %v188_v10, 0 }
  0x3e   :  { %265 = vmatpush.msrb.mxu1 %v165_v17  ;;  %320 = vmatpush.msrb.mxu2 %v283_v50 }
  0x3f   :  { %246 = vmatpush.msrb.mxu0 %v131_v18  ;;  %340 = vmatpush.msrb.mxu3 %v299_v49 }
  0x40   :  { %266 = vmatpush.msrb.mxu1 %v163_v22  ;;  %321 = vmatpush.msrb.mxu2 %v282_v63 }
  0x41   :  { %247 = vmatpush.msrb.mxu0 %v129_v21  ;;  %341 = vmatpush.msrb.mxu3 %v298_v51 }
  0x42   :  { %267 = vmatpush.msrb.mxu1 %v161_v26  ;;  %322 = vmatpush.msrb.mxu2 %v281_v1 }
  0x43   :  { %248 = vmatpush.msrb.mxu0 %v127_v25  ;;  %342 = vmatpush.msrb.mxu3 %v297_v52 }
  0x44   :  { %268 = vmatpush.msrb.mxu1 %v159_v30  ;;  %323 = vmatpush.msrb.mxu2 %v280_v3 }
  0x45   :  { %249 = vmatpush.msrb.mxu0 %v125_v29  ;;  %343 = vmatpush.msrb.mxu3 %v296_v54 }
  0x46   :  { %269 = vmatpush.msrb.mxu1 %v157_v32  ;;  %324 = vmatpush.msrb.mxu2 %v279_v5 }
  0x47   :  { %344 = vmatpush.msrb.mxu3 %v295_v0 }
  0x48   :  { %325 = vmatpush.msrb.mxu2 %v278_v7 }
  0x49   :  { %345 = vmatpush.msrb.mxu3 %v294_v2 }
  0x4a   :  { %326 = vmatpush.msrb.mxu2 %v277_v8 }
  0x4b   :  { %346 = vmatpush.msrb.mxu3 %v293_v4 }
  0x4c   :  { %327 = vmatpush.msrb.mxu2 %v276_v9 }
  0x4d   :  { %347 = vmatpush.msrb.mxu3 %v292_v6 }
  0xa3   :  { %v99_v57 = vpop.f32.mrf.mxu0 }
  0xa4   :  { %v119_v58 = vpop.f32.mrf.mxu1  ;;  %v100_v59 = vadd.f32 %v99_v57, %v78_v55 }
  0xa5   :  { %v120_v60 = vadd.f32 %v119_v58, %v79_v56 }
  0xa6   :  { %v122_v61 = vmax.f32 %v100_v59, 0.0 }
  0xa7   :  { %v123_v62 = vmax.f32 %v120_v60, 0.0 }
  0xa8   :  { %210 = vmatmul.f32.vlgmr.msra.gmra.mxu2 %v122_v61  ;;  %250 = vmatmul.f32.vlgmr.msrb.gmra.mxu0 %v122_v61 }
  0xa9   :  { %230 = vmatmul.f32.vlgmr.msra.gmra.mxu3 %v123_v62  ;;  %270 = vmatmul.f32.vlgmr.msrb.gmra.mxu1 %v123_v62 }
 0x125   :  { %v251_v12 = vpop.f32.mrf.mxu0 }
 0x126   :  { %v252_v13 = vadd.f32 %v251_v12, %v191_v11  ;;  %v271_v14 = vpop.f32.mrf.mxu1 }
 0x128   :  { %v272_v15 = vadd.f32 %v271_v14, %v252_v13 }
 0x12a   :  { %v275_v17 = vmax.f32 %v272_v15, 0.0 }
 0x12b   :  { %v211_v18 = vpop.f32.mrf.mxu2 }
 0x12c   :  { %v212_v19 = vadd.f32 %v211_v18, %v190_v16  ;;  %348 = vmatmul.f32.vlgmr.msrb.gmra.mxu3 %v275_v17  ;;  %v231_v20 = vpop.f32.mrf.mxu3 }
 0x12e   :  { %v232_v21 = vadd.f32 %v231_v20, %v212_v19 }
 0x130   :  { %v274_v22 = vmax.f32 %v232_v21, 0.0 }
 0x132   :  { %328 = vmatmul.f32.vlgmr.msrb.gmra.mxu2 %v274_v22 }
 0x1af   :  { %v349_v26 = vpop.f32.mrf.mxu3 }
 0x1b5   :  { %v329_v24 = vpop.f32.mrf.mxu2 }
 0x1b6   :  { %v330_v25 = vadd.f32 %v375_v23, %v329_v24 }
 0x1b8   :  { %v350_v27 = vadd.f32 %v349_v26, %v330_v25 }
 0x1ba   :  { %353 = vst.msk [vmem:[#allocation5] sm:$0xff] %vm352_vm0, %v350_v27 }
 0x1bb   :  { %364 = dma.vmem_to_hbm [thread:$0]  %s360_s15, 128, %s362_s2, [#allocation4]  }
 0x1bc   :  { %426 = dma.done.wait [#allocation4], 128  }
 0x1bd   :  { %427 = vsyncadd [#allocation4], 4294967168 }
 0x1be   :  { %369 = vsyncpa [#allocation3], 1 }
 0x1bf   :  { %370 = vsyncpa [#allocation4], 1 }

</bundles_post_ra>
